<compile_context>
chip_gen: v7x
topology: tpu7x:2x2x1
jax: 0.10.0
libtpu: 0.0.40
codegen_flags: <defaults>
</compile_context>

<pallas_src>
import functools
import math

import jax
import jax.numpy as jnp
from jax.experimental import pallas as pl
from jax.experimental.pallas import tpu as pltpu

LINEAR_OUTPUT = 2      # disModel.linearOutput
O_PAD = 128            # lane-dense padded width for the final linear output


# ----------------------------- Pallas kernel ------------------------------- #

def _fused_dis_model_kernel(T, B, H,
                            x_ref, wproj_ref, bproj_ref, wstep_ref,
                            wlin_ref, blin_ref, out_ref):
    """Fused forward: skew-interleaved 2-layer LSTM + Linear(last hidden).

    x_ref:     (B*T, D)    batch-major flattened input (free reshape of (B,T,D))
    wproj_ref: (D, 8H)     layer-0 input weights, gate-interleaved, layer-1 cols zero
    bproj_ref: (1, 8H)     gate-interleaved biases: [b0 | b1] per gate group
    wstep_ref: (2H, 8H)    fused recurrent block matrix  [[Whh0 , Wih1],[0 , Whh1]]
                           (columns gate-interleaved)
    wlin_ref:  (2H, O_PAD) final linear: layer-0 rows zero, layer-1 rows = lin_w.T
    blin_ref:  (1, O_PAD)  linear bias, zero-padded
    out_ref:   (B, O_PAD)  lane-dense output slab (first LINEAR_OUTPUT cols real)
    """
    H2 = 2 * H   # packed state width   [layer0 | layer1]

    # ---- Hoisted input projection: one matmul for the whole sequence ----
    # Rows are batch-major (row = b*T + t). Layer-0 gate lanes hold x_t @ Wih0 + b0;
    # layer-1 gate lanes hold just b1 (their data-dependent part comes from the fused
    # recurrent matmul below).
    bproj = bproj_ref[...]
    g_in = (jnp.dot(x_ref[...], wproj_ref[...],
                    preferred_element_type=jnp.float32) + bproj)        # (B*T, 8H)

    # Loop-invariant fused recurrent weights, loaded once so the MXU RHS can stay staged
    # across the unrolled steps.
    # TODO(synk): if a bundle dump shows per-step RHS re-pushes, drive the MXU explicitly
    # with pltpu.matmul_push_rhs / matmul_acc_lhs / matmul_pop.
    w_step = wstep_ref[...]                                              # (2H, 8H)

    hc = jnp.zeros((B, H2), jnp.float32)   # [h0 | h1]
    cc = jnp.zeros((B, H2), jnp.float32)   # [c0 | c1]
    lane = jax.lax.broadcasted_iota(jnp.int32, (B, H2), 1)
    layer0_lanes = lane < H

    # T+1 skewed, fully-unrolled steps: step s advances layer 0 to timestep s and
    # layer 1 to timestep s-1.
    for s in range(T + 1):
        if s < T:
            # Gather the B batch rows of timestep s (static slices, independent of the
            # recurrent state -> off the serial critical path).
            g_s = jnp.concatenate(
                [g_in[b * T + s: b * T + s + 1, :] for b in range(B)], axis=0)
        else:
            # Last step only advances layer 1; its layer-0 half is unused.
            g_s = bproj

        # ONE fused recurrent matmul for both layers (256-wide output).
        gates = jnp.dot(hc, w_step, preferred_element_type=jnp.float32) + g_s  # (B, 8H)

        # Both layers' LSTM cells at once, lane-aligned with the packed state.
        sig = jax.nn.sigmoid(gates)                  # i/f/o gates (g lanes unused)
        i_b = sig[:, 0 * H2:1 * H2]
        f_b = sig[:, 1 * H2:2 * H2]
        g_b = jnp.tanh(gates[:, 2 * H2:3 * H2])      # only the 64-lane g block
        o_b = sig[:, 3 * H2:4 * H2]
        cc = f_b * cc + i_b * g_b
        hc = o_b * jnp.tanh(cc)

        if s == 0:
            # Layer 1 has not executed a real timestep yet: keep its state at zero.
            hc = jnp.where(layer0_lanes, hc, 0.0)
            cc = jnp.where(layer0_lanes, cc, 0.0)

    # ---- Final linear on the last layer-1 hidden state ----
    # wlin's layer-0 rows are zero, so the packed state feeds it directly:
    # a single lane-dense (B, 128) store.
    out_ref[...] = (jnp.dot(hc, wlin_ref[...],
                            preferred_element_type=jnp.float32) + blin_ref[...])


# ------------------------------- wrappers ---------------------------------- #

_VMEM = pl.BlockSpec(memory_space=pltpu.MemorySpace.VMEM)


@jax.jit
def dis_model_forward(prep, x):
    """Equivalent of disModel.forward: x (B, T, input_size) -> (B, 2)."""
    # TODO(synk): pt.printTrack() in the original forward is a debug trace (no-op here).
    B, T, D = x.shape
    H = prep["wstep"].shape[0] // 2
    x_flat = x.reshape(B * T, D)            # free reshape, no transpose / HBM round trip
    out_pad = pl.pallas_call(
        functools.partial(_fused_dis_model_kernel, T, B, H),
        out_shape=jax.ShapeDtypeStruct((B, O_PAD), jnp.float32),
        in_specs=[_VMEM] * 6,
        out_specs=_VMEM,
    )(x_flat, prep["wproj"], prep["bproj"], prep["wstep"],
      prep["wlin"], prep["blin"])
    # Lane-dense slab from the kernel; slice to the module's (B, 2) at the consumer.
    return out_pad[:, :LINEAR_OUTPUT]


def _interleave_gates(a0, a1, H):
    """[i|f|g|o] blocks of a0, a1 (..., 4H) -> (..., 8H) as [i0 i1 f0 f1 g0 g1 o0 o1]."""
    parts = []
    for k in range(4):
        parts.append(a0[..., k * H:(k + 1) * H])
        parts.append(a1[..., k * H:(k + 1) * H])
    return jnp.concatenate(parts, axis=-1)


def prepare_params(params):
    """One-time layout prep: fused block-recurrent matrix, interleaved gate layout,
    merged biases, lane-dense padded linear."""
    assert len(params["lstm"]) == 2, "fused kernel is specialized to num_layers=2"
    l0, l1 = params["lstm"]
    H = l0["w_hh"].shape[1]
    D = l0["w_ih"].shape[1]

    wih0_t = jnp.transpose(l0["w_ih"])          # (D, 4H)
    whh0_t = jnp.transpose(l0["w_hh"])          # (H, 4H)
    wih1_t = jnp.transpose(l1["w_ih"])          # (H, 4H)
    whh1_t = jnp.transpose(l1["w_hh"])          # (H, 4H)
    b0 = (l0["b_ih"] + l0["b_hh"]).reshape(1, 4 * H)
    b1 = (l1["b_ih"] + l1["b_hh"]).reshape(1, 4 * H)

    # Input projection: layer-0 gate positions carry Wih0, layer-1 positions are zero
    # (their data-dependent part comes from the per-step fused matmul).
    wproj = _interleave_gates(wih0_t, jnp.zeros((D, 4 * H), jnp.float32), H)   # (D, 8H)
    bproj = _interleave_gates(b0, b1, H)                                       # (1, 8H)

    # Fused per-step recurrent block matrix:  [h0 | h1] @ [[Whh0 , Wih1],[0 , Whh1]].
    wstep = jnp.concatenate(
        [_interleave_gates(whh0_t, wih1_t, H),
         _interleave_gates(jnp.zeros((H, 4 * H), jnp.float32), whh1_t, H)],
        axis=0)                                                                # (2H, 8H)

    lin_w = params["lin_w"]                     # (O, H)
    lin_b = params["lin_b"]                     # (O,)
    O = lin_w.shape[0]
    # Final linear reads the packed [h0|h1] state: layer-0 rows zero, lane-dense pad.
    wlin = jnp.zeros((2 * H, O_PAD), jnp.float32).at[H:, :O].set(jnp.transpose(lin_w))
    blin = jnp.zeros((1, O_PAD), jnp.float32).at[0, :O].set(lin_b)

    return dict(wproj=wproj, bproj=bproj, wstep=wstep, wlin=wlin, blin=blin)


# --------------------------- parameter creation ----------------------------- #

def init_params(key, input_size, lstm_size, num_layers, linear_output=LINEAR_OUTPUT):
    """Deterministic init mimicking PyTorch's U(-1/sqrt(H), 1/sqrt(H))."""
    k = 1.0 / math.sqrt(lstm_size)
    keys = iter(jax.random.split(key, num_layers * 4 + 2))
    layers = []
    for l in range(num_layers):
        d_in = input_size if l == 0 else lstm_size
        layers.append(dict(
            w_ih=jax.random.uniform(next(keys), (4 * lstm_size, d_in),
                                    jnp.float32, -k, k),
            w_hh=jax.random.uniform(next(keys), (4 * lstm_size, lstm_size),
                                    jnp.float32, -k, k),
            b_ih=jax.random.uniform(next(keys), (4 * lstm_size,),
                                    jnp.float32, -k, k),
            b_hh=jax.random.uniform(next(keys), (4 * lstm_size,),
                                    jnp.float32, -k, k),
        ))
    lin_w = jax.random.uniform(next(keys), (linear_output, lstm_size),
                               jnp.float32, -k, k)
    lin_b = jax.random.uniform(next(keys), (linear_output,),
                               jnp.float32, -k, k)
    return {"lstm": layers, "lin_w": lin_w, "lin_b": lin_b}


# --------------------------- pure-JAX reference ------------------------------ #

def dis_model_reference(params, x):
    """Pure-JAX reference mirroring PyTorch nn.LSTM(batch_first) + Linear."""
    B, T, _ = x.shape
    h_seq = x
    for layer in params["lstm"]:
        H = layer["w_hh"].shape[1]
        wih_t, whh_t = layer["w_ih"].T, layer["w_hh"].T
        b = layer["b_ih"] + layer["b_hh"]
        h = jnp.zeros((B, H), jnp.float32)
        c = jnp.zeros((B, H), jnp.float32)
        outs = []
        for t in range(T):
            gates = h_seq[:, t, :] @ wih_t + h @ whh_t + b
            i_g = jax.nn.sigmoid(gates[:, 0 * H:1 * H])
            f_g = jax.nn.sigmoid(gates[:, 1 * H:2 * H])
            g_g = jnp.tanh(gates[:, 2 * H:3 * H])
            o_g = jax.nn.sigmoid(gates[:, 3 * H:4 * H])
            c = f_g * c + i_g * g_g
            h = o_g * jnp.tanh(c)
            outs.append(h)
        h_seq = jnp.stack(outs, axis=1)
    return h_seq[:, -1, :] @ params["lin_w"].T + params["lin_b"]


# ---------------------------------- main ------------------------------------ #

if __name__ == "__main__":
    B, T = 2, 8
    input_size, lstm_size, num_layers = 16, 32, 2   # opt.lstm_size=32, opt.num_layers=2

    root = jax.random.PRNGKey(0)
    k_params, k_x = jax.random.split(root)
    params = init_params(k_params, input_size, lstm_size, num_layers)
    prep = prepare_params(params)
    x = jax.random.normal(k_x, (B, T, input_size), jnp.float32)

    out = dis_model_forward(prep, x)
    out = jax.block_until_ready(out)
    assert out.shape == (B, LINEAR_OUTPUT) and out.dtype == jnp.float32

    ref = dis_model_reference(params, x)
    max_err = float(jnp.max(jnp.abs(out - ref)))
    assert max_err < 1e-4, f"mismatch vs reference: {max_err}"

    print("KERNEL_OK")
</pallas_src>

<mosaic_0001>
module attributes {stable_mosaic.version = 11 : i64} {
  func.func @_fused_dis_model_kernel(%arg0: memref<16x16xf32, #tpu.memory_space<vmem>>, %arg1: memref<16x256xf32, #tpu.memory_space<vmem>>, %arg2: memref<1x256xf32, #tpu.memory_space<vmem>>, %arg3: memref<64x256xf32, #tpu.memory_space<vmem>>, %arg4: memref<64x128xf32, #tpu.memory_space<vmem>>, %arg5: memref<1x128xf32, #tpu.memory_space<vmem>>, %arg6: memref<2x128xf32, #tpu.memory_space<vmem>>) attributes {dimension_semantics = [], scalar_prefetch = 0 : i64, scratch_operands = 0 : i64, tpu.core_type = #tpu.core_type<tc>} {
    %c0 = arith.constant 0 : index
    %c0_0 = arith.constant 0 : index
    %0 = vector.load %arg2[%c0, %c0_0] : memref<1x256xf32, #tpu.memory_space<vmem>>, vector<1x256xf32>
    %c0_1 = arith.constant 0 : index
    %c0_2 = arith.constant 0 : index
    %1 = vector.load %arg0[%c0_1, %c0_2] : memref<16x16xf32, #tpu.memory_space<vmem>>, vector<16x16xf32>
    %c0_3 = arith.constant 0 : index
    %c0_4 = arith.constant 0 : index
    %2 = vector.load %arg1[%c0_3, %c0_4] : memref<16x256xf32, #tpu.memory_space<vmem>>, vector<16x256xf32>
    %cst = arith.constant dense<0.000000e+00> : vector<16x256xf32>
    %3 = tpu.matmul %1, %2, %cst {dimension_numbers = #tpu.dot_dimension_numbers<[1], [0], [0], [1], [0, 0, 1, 1], [], []>} : vector<16x16xf32>, vector<16x256xf32>, vector<16x256xf32> -> vector<16x256xf32>
    %4 = vector.broadcast %0 : vector<1x256xf32> to vector<16x256xf32>
    %5 = arith.addf %3, %4 : vector<16x256xf32>
    %c0_5 = arith.constant 0 : index
    %c0_6 = arith.constant 0 : index
    %6 = vector.load %arg3[%c0_5, %c0_6] : memref<64x256xf32, #tpu.memory_space<vmem>>, vector<64x256xf32>
    %cst_7 = arith.constant 0.000000e+00 : f32
    %7 = vector.broadcast %cst_7 : f32 to vector<2x64xf32>
    %cst_8 = arith.constant 0.000000e+00 : f32
    %8 = vector.broadcast %cst_8 : f32 to vector<2x64xf32>
    %9 = tpu.iota {dimensions = array<i32: 1>} : vector<2x64xi32>
    %c32_i32 = arith.constant 32 : i32
    %10 = vector.broadcast %c32_i32 : i32 to vector<2x64xi32>
    %11 = arith.cmpi slt, %9, %10 : vector<2x64xi32>
    %12 = vector.extract_strided_slice %5 {offsets = [0, 0], sizes = [1, 256], strides = [1, 1]} : vector<16x256xf32> to vector<1x256xf32>
    %13 = vector.extract_strided_slice %5 {offsets = [8, 0], sizes = [1, 256], strides = [1, 1]} : vector<16x256xf32> to vector<1x256xf32>
    %14 = tpu.concatenate %12, %13 in 0 : vector<1x256xf32>, vector<1x256xf32> -> vector<2x256xf32>
    %cst_9 = arith.constant dense<0.000000e+00> : vector<2x256xf32>
    %15 = tpu.matmul %7, %6, %cst_9 {dimension_numbers = #tpu.dot_dimension_numbers<[1], [0], [0], [1], [0, 0, 1, 1], [], []>} : vector<2x64xf32>, vector<64x256xf32>, vector<2x256xf32> -> vector<2x256xf32>
    %16 = arith.addf %15, %14 : vector<2x256xf32>
    %17 = arith.negf %16 : vector<2x256xf32>
    %18 = math.exp %17 : vector<2x256xf32>
    %cst_10 = arith.constant 1.000000e+00 : f32
    %19 = vector.broadcast %cst_10 : f32 to vector<2x256xf32>
    %20 = arith.addf %19, %18 : vector<2x256xf32>
    %21 = arith.divf %19, %20 : vector<2x256xf32>
    %22 = vector.extract_strided_slice %21 {offsets = [0, 0], sizes = [2, 64], strides = [1, 1]} : vector<2x256xf32> to vector<2x64xf32>
    %23 = vector.extract_strided_slice %21 {offsets = [0, 64], sizes = [2, 64], strides = [1, 1]} : vector<2x256xf32> to vector<2x64xf32>
    %24 = vector.extract_strided_slice %16 {offsets = [0, 128], sizes = [2, 64], strides = [1, 1]} : vector<2x256xf32> to vector<2x64xf32>
    %25 = math.tanh %24 : vector<2x64xf32>
    %26 = vector.extract_strided_slice %21 {offsets = [0, 192], sizes = [2, 64], strides = [1, 1]} : vector<2x256xf32> to vector<2x64xf32>
    %27 = arith.mulf %23, %8 : vector<2x64xf32>
    %28 = arith.mulf %22, %25 : vector<2x64xf32>
    %29 = arith.addf %27, %28 : vector<2x64xf32>
    %30 = math.tanh %29 : vector<2x64xf32>
    %31 = arith.mulf %26, %30 : vector<2x64xf32>
    %cst_11 = arith.constant 0.000000e+00 : f32
    %32 = vector.broadcast %cst_11 : f32 to vector<2x64xf32>
    %33 = arith.select %11, %31, %32 : vector<2x64xi1>, vector<2x64xf32>
    %cst_12 = arith.constant 0.000000e+00 : f32
    %34 = vector.broadcast %cst_12 : f32 to vector<2x64xf32>
    %35 = arith.select %11, %29, %34 : vector<2x64xi1>, vector<2x64xf32>
    %36 = vector.extract_strided_slice %5 {offsets = [1, 0], sizes = [1, 256], strides = [1, 1]} : vector<16x256xf32> to vector<1x256xf32>
    %37 = vector.extract_strided_slice %5 {offsets = [9, 0], sizes = [1, 256], strides = [1, 1]} : vector<16x256xf32> to vector<1x256xf32>
    %38 = tpu.concatenate %36, %37 in 0 : vector<1x256xf32>, vector<1x256xf32> -> vector<2x256xf32>
    %cst_13 = arith.constant dense<0.000000e+00> : vector<2x256xf32>
    %39 = tpu.matmul %33, %6, %cst_13 {dimension_numbers = #tpu.dot_dimension_numbers<[1], [0], [0], [1], [0, 0, 1, 1], [], []>} : vector<2x64xf32>, vector<64x256xf32>, vector<2x256xf32> -> vector<2x256xf32>
    %40 = arith.addf %39, %38 : vector<2x256xf32>
    %41 = arith.negf %40 : vector<2x256xf32>
    %42 = math.exp %41 : vector<2x256xf32>
    %cst_14 = arith.constant 1.000000e+00 : f32
    %43 = vector.broadcast %cst_14 : f32 to vector<2x256xf32>
    %44 = arith.addf %43, %42 : vector<2x256xf32>
    %45 = arith.divf %43, %44 : vector<2x256xf32>
    %46 = vector.extract_strided_slice %45 {offsets = [0, 0], sizes = [2, 64], strides = [1, 1]} : vector<2x256xf32> to vector<2x64xf32>
    %47 = vector.extract_strided_slice %45 {offsets = [0, 64], sizes = [2, 64], strides = [1, 1]} : vector<2x256xf32> to vector<2x64xf32>
    %48 = vector.extract_strided_slice %40 {offsets = [0, 128], sizes = [2, 64], strides = [1, 1]} : vector<2x256xf32> to vector<2x64xf32>
    %49 = math.tanh %48 : vector<2x64xf32>
    %50 = vector.extract_strided_slice %45 {offsets = [0, 192], sizes = [2, 64], strides = [1, 1]} : vector<2x256xf32> to vector<2x64xf32>
    %51 = arith.mulf %47, %35 : vector<2x64xf32>
    %52 = arith.mulf %46, %49 : vector<2x64xf32>
    %53 = arith.addf %51, %52 : vector<2x64xf32>
    %54 = math.tanh %53 : vector<2x64xf32>
    %55 = arith.mulf %50, %54 : vector<2x64xf32>
    %56 = vector.extract_strided_slice %5 {offsets = [2, 0], sizes = [1, 256], strides = [1, 1]} : vector<16x256xf32> to vector<1x256xf32>
    %57 = vector.extract_strided_slice %5 {offsets = [10, 0], sizes = [1, 256], strides = [1, 1]} : vector<16x256xf32> to vector<1x256xf32>
    %58 = tpu.concatenate %56, %57 in 0 : vector<1x256xf32>, vector<1x256xf32> -> vector<2x256xf32>
    %cst_15 = arith.constant dense<0.000000e+00> : vector<2x256xf32>
    %59 = tpu.matmul %55, %6, %cst_15 {dimension_numbers = #tpu.dot_dimension_numbers<[1], [0], [0], [1], [0, 0, 1, 1], [], []>} : vector<2x64xf32>, vector<64x256xf32>, vector<2x256xf32> -> vector<2x256xf32>
    %60 = arith.addf %59, %58 : vector<2x256xf32>
    %61 = arith.negf %60 : vector<2x256xf32>
    %62 = math.exp %61 : vector<2x256xf32>
    %cst_16 = arith.constant 1.000000e+00 : f32
    %63 = vector.broadcast %cst_16 : f32 to vector<2x256xf32>
    %64 = arith.addf %63, %62 : vector<2x256xf32>
    %65 = arith.divf %63, %64 : vector<2x256xf32>
    %66 = vector.extract_strided_slice %65 {offsets = [0, 0], sizes = [2, 64], strides = [1, 1]} : vector<2x256xf32> to vector<2x64xf32>
    %67 = vector.extract_strided_slice %65 {offsets = [0, 64], sizes = [2, 64], strides = [1, 1]} : vector<2x256xf32> to vector<2x64xf32>
    %68 = vector.extract_strided_slice %60 {offsets = [0, 128], sizes = [2, 64], strides = [1, 1]} : vector<2x256xf32> to vector<2x64xf32>
    %69 = math.tanh %68 : vector<2x64xf32>
    %70 = vector.extract_strided_slice %65 {offsets = [0, 192], sizes = [2, 64], strides = [1, 1]} : vector<2x256xf32> to vector<2x64xf32>
    %71 = arith.mulf %67, %53 : vector<2x64xf32>
    %72 = arith.mulf %66, %69 : vector<2x64xf32>
    %73 = arith.addf %71, %72 : vector<2x64xf32>
    %74 = math.tanh %73 : vector<2x64xf32>
    %75 = arith.mulf %70, %74 : vector<2x64xf32>
    %76 = vector.extract_strided_slice %5 {offsets = [3, 0], sizes = [1, 256], strides = [1, 1]} : vector<16x256xf32> to vector<1x256xf32>
    %77 = vector.extract_strided_slice %5 {offsets = [11, 0], sizes = [1, 256], strides = [1, 1]} : vector<16x256xf32> to vector<1x256xf32>
    %78 = tpu.concatenate %76, %77 in 0 : vector<1x256xf32>, vector<1x256xf32> -> vector<2x256xf32>
    %cst_17 = arith.constant dense<0.000000e+00> : vector<2x256xf32>
    %79 = tpu.matmul %75, %6, %cst_17 {dimension_numbers = #tpu.dot_dimension_numbers<[1], [0], [0], [1], [0, 0, 1, 1], [], []>} : vector<2x64xf32>, vector<64x256xf32>, vector<2x256xf32> -> vector<2x256xf32>
    %80 = arith.addf %79, %78 : vector<2x256xf32>
    %81 = arith.negf %80 : vector<2x256xf32>
    %82 = math.exp %81 : vector<2x256xf32>
    %cst_18 = arith.constant 1.000000e+00 : f32
    %83 = vector.broadcast %cst_18 : f32 to vector<2x256xf32>
    %84 = arith.addf %83, %82 : vector<2x256xf32>
    %85 = arith.divf %83, %84 : vector<2x256xf32>
    %86 = vector.extract_strided_slice %85 {offsets = [0, 0], sizes = [2, 64], strides = [1, 1]} : vector<2x256xf32> to vector<2x64xf32>
    %87 = vector.extract_strided_slice %85 {offsets = [0, 64], sizes = [2, 64], strides = [1, 1]} : vector<2x256xf32> to vector<2x64xf32>
    %88 = vector.extract_strided_slice %80 {offsets = [0, 128], sizes = [2, 64], strides = [1, 1]} : vector<2x256xf32> to vector<2x64xf32>
    %89 = math.tanh %88 : vector<2x64xf32>
    %90 = vector.extract_strided_slice %85 {offsets = [0, 192], sizes = [2, 64], strides = [1, 1]} : vector<2x256xf32> to vector<2x64xf32>
    %91 = arith.mulf %87, %73 : vector<2x64xf32>
    %92 = arith.mulf %86, %89 : vector<2x64xf32>
    %93 = arith.addf %91, %92 : vector<2x64xf32>
    %94 = math.tanh %93 : vector<2x64xf32>
    %95 = arith.mulf %90, %94 : vector<2x64xf32>
    %96 = vector.extract_strided_slice %5 {offsets = [4, 0], sizes = [1, 256], strides = [1, 1]} : vector<16x256xf32> to vector<1x256xf32>
    %97 = vector.extract_strided_slice %5 {offsets = [12, 0], sizes = [1, 256], strides = [1, 1]} : vector<16x256xf32> to vector<1x256xf32>
    %98 = tpu.concatenate %96, %97 in 0 : vector<1x256xf32>, vector<1x256xf32> -> vector<2x256xf32>
    %cst_19 = arith.constant dense<0.000000e+00> : vector<2x256xf32>
    %99 = tpu.matmul %95, %6, %cst_19 {dimension_numbers = #tpu.dot_dimension_numbers<[1], [0], [0], [1], [0, 0, 1, 1], [], []>} : vector<2x64xf32>, vector<64x256xf32>, vector<2x256xf32> -> vector<2x256xf32>
    %100 = arith.addf %99, %98 : vector<2x256xf32>
    %101 = arith.negf %100 : vector<2x256xf32>
    %102 = math.exp %101 : vector<2x256xf32>
    %cst_20 = arith.constant 1.000000e+00 : f32
    %103 = vector.broadcast %cst_20 : f32 to vector<2x256xf32>
    %104 = arith.addf %103, %102 : vector<2x256xf32>
    %105 = arith.divf %103, %104 : vector<2x256xf32>
    %106 = vector.extract_strided_slice %105 {offsets = [0, 0], sizes = [2, 64], strides = [1, 1]} : vector<2x256xf32> to vector<2x64xf32>
    %107 = vector.extract_strided_slice %105 {offsets = [0, 64], sizes = [2, 64], strides = [1, 1]} : vector<2x256xf32> to vector<2x64xf32>
    %108 = vector.extract_strided_slice %100 {offsets = [0, 128], sizes = [2, 64], strides = [1, 1]} : vector<2x256xf32> to vector<2x64xf32>
    %109 = math.tanh %108 : vector<2x64xf32>
    %110 = vector.extract_strided_slice %105 {offsets = [0, 192], sizes = [2, 64], strides = [1, 1]} : vector<2x256xf32> to vector<2x64xf32>
    %111 = arith.mulf %107, %93 : vector<2x64xf32>
    %112 = arith.mulf %106, %109 : vector<2x64xf32>
    %113 = arith.addf %111, %112 : vector<2x64xf32>
    %114 = math.tanh %113 : vector<2x64xf32>
    %115 = arith.mulf %110, %114 : vector<2x64xf32>
    %116 = vector.extract_strided_slice %5 {offsets = [5, 0], sizes = [1, 256], strides = [1, 1]} : vector<16x256xf32> to vector<1x256xf32>
    %117 = vector.extract_strided_slice %5 {offsets = [13, 0], sizes = [1, 256], strides = [1, 1]} : vector<16x256xf32> to vector<1x256xf32>
    %118 = tpu.concatenate %116, %117 in 0 : vector<1x256xf32>, vector<1x256xf32> -> vector<2x256xf32>
    %cst_21 = arith.constant dense<0.000000e+00> : vector<2x256xf32>
    %119 = tpu.matmul %115, %6, %cst_21 {dimension_numbers = #tpu.dot_dimension_numbers<[1], [0], [0], [1], [0, 0, 1, 1], [], []>} : vector<2x64xf32>, vector<64x256xf32>, vector<2x256xf32> -> vector<2x256xf32>
    %120 = arith.addf %119, %118 : vector<2x256xf32>
    %121 = arith.negf %120 : vector<2x256xf32>
    %122 = math.exp %121 : vector<2x256xf32>
    %cst_22 = arith.constant 1.000000e+00 : f32
    %123 = vector.broadcast %cst_22 : f32 to vector<2x256xf32>
    %124 = arith.addf %123, %122 : vector<2x256xf32>
    %125 = arith.divf %123, %124 : vector<2x256xf32>
    %126 = vector.extract_strided_slice %125 {offsets = [0, 0], sizes = [2, 64], strides = [1, 1]} : vector<2x256xf32> to vector<2x64xf32>
    %127 = vector.extract_strided_slice %125 {offsets = [0, 64], sizes = [2, 64], strides = [1, 1]} : vector<2x256xf32> to vector<2x64xf32>
    %128 = vector.extract_strided_slice %120 {offsets = [0, 128], sizes = [2, 64], strides = [1, 1]} : vector<2x256xf32> to vector<2x64xf32>
    %129 = math.tanh %128 : vector<2x64xf32>
    %130 = vector.extract_strided_slice %125 {offsets = [0, 192], sizes = [2, 64], strides = [1, 1]} : vector<2x256xf32> to vector<2x64xf32>
    %131 = arith.mulf %127, %113 : vector<2x64xf32>
    %132 = arith.mulf %126, %129 : vector<2x64xf32>
    %133 = arith.addf %131, %132 : vector<2x64xf32>
    %134 = math.tanh %133 : vector<2x64xf32>
    %135 = arith.mulf %130, %134 : vector<2x64xf32>
    %136 = vector.extract_strided_slice %5 {offsets = [6, 0], sizes = [1, 256], strides = [1, 1]} : vector<16x256xf32> to vector<1x256xf32>
    %137 = vector.extract_strided_slice %5 {offsets = [14, 0], sizes = [1, 256], strides = [1, 1]} : vector<16x256xf32> to vector<1x256xf32>
    %138 = tpu.concatenate %136, %137 in 0 : vector<1x256xf32>, vector<1x256xf32> -> vector<2x256xf32>
    %cst_23 = arith.constant dense<0.000000e+00> : vector<2x256xf32>
    %139 = tpu.matmul %135, %6, %cst_23 {dimension_numbers = #tpu.dot_dimension_numbers<[1], [0], [0], [1], [0, 0, 1, 1], [], []>} : vector<2x64xf32>, vector<64x256xf32>, vector<2x256xf32> -> vector<2x256xf32>
    %140 = arith.addf %139, %138 : vector<2x256xf32>
    %141 = arith.negf %140 : vector<2x256xf32>
    %142 = math.exp %141 : vector<2x256xf32>
    %cst_24 = arith.constant 1.000000e+00 : f32
    %143 = vector.broadcast %cst_24 : f32 to vector<2x256xf32>
    %144 = arith.addf %143, %142 : vector<2x256xf32>
    %145 = arith.divf %143, %144 : vector<2x256xf32>
    %146 = vector.extract_strided_slice %145 {offsets = [0, 0], sizes = [2, 64], strides = [1, 1]} : vector<2x256xf32> to vector<2x64xf32>
    %147 = vector.extract_strided_slice %145 {offsets = [0, 64], sizes = [2, 64], strides = [1, 1]} : vector<2x256xf32> to vector<2x64xf32>
    %148 = vector.extract_strided_slice %140 {offsets = [0, 128], sizes = [2, 64], strides = [1, 1]} : vector<2x256xf32> to vector<2x64xf32>
    %149 = math.tanh %148 : vector<2x64xf32>
    %150 = vector.extract_strided_slice %145 {offsets = [0, 192], sizes = [2, 64], strides = [1, 1]} : vector<2x256xf32> to vector<2x64xf32>
    %151 = arith.mulf %147, %133 : vector<2x64xf32>
    %152 = arith.mulf %146, %149 : vector<2x64xf32>
    %153 = arith.addf %151, %152 : vector<2x64xf32>
    %154 = math.tanh %153 : vector<2x64xf32>
    %155 = arith.mulf %150, %154 : vector<2x64xf32>
    %156 = vector.extract_strided_slice %5 {offsets = [7, 0], sizes = [1, 256], strides = [1, 1]} : vector<16x256xf32> to vector<1x256xf32>
    %157 = vector.extract_strided_slice %5 {offsets = [15, 0], sizes = [1, 256], strides = [1, 1]} : vector<16x256xf32> to vector<1x256xf32>
    %158 = tpu.concatenate %156, %157 in 0 : vector<1x256xf32>, vector<1x256xf32> -> vector<2x256xf32>
    %cst_25 = arith.constant dense<0.000000e+00> : vector<2x256xf32>
    %159 = tpu.matmul %155, %6, %cst_25 {dimension_numbers = #tpu.dot_dimension_numbers<[1], [0], [0], [1], [0, 0, 1, 1], [], []>} : vector<2x64xf32>, vector<64x256xf32>, vector<2x256xf32> -> vector<2x256xf32>
    %160 = arith.addf %159, %158 : vector<2x256xf32>
    %161 = arith.negf %160 : vector<2x256xf32>
    %162 = math.exp %161 : vector<2x256xf32>
    %cst_26 = arith.constant 1.000000e+00 : f32
    %163 = vector.broadcast %cst_26 : f32 to vector<2x256xf32>
    %164 = arith.addf %163, %162 : vector<2x256xf32>
    %165 = arith.divf %163, %164 : vector<2x256xf32>
    %166 = vector.extract_strided_slice %165 {offsets = [0, 0], sizes = [2, 64], strides = [1, 1]} : vector<2x256xf32> to vector<2x64xf32>
    %167 = vector.extract_strided_slice %165 {offsets = [0, 64], sizes = [2, 64], strides = [1, 1]} : vector<2x256xf32> to vector<2x64xf32>
    %168 = vector.extract_strided_slice %160 {offsets = [0, 128], sizes = [2, 64], strides = [1, 1]} : vector<2x256xf32> to vector<2x64xf32>
    %169 = math.tanh %168 : vector<2x64xf32>
    %170 = vector.extract_strided_slice %165 {offsets = [0, 192], sizes = [2, 64], strides = [1, 1]} : vector<2x256xf32> to vector<2x64xf32>
    %171 = arith.mulf %167, %153 : vector<2x64xf32>
    %172 = arith.mulf %166, %169 : vector<2x64xf32>
    %173 = arith.addf %171, %172 : vector<2x64xf32>
    %174 = math.tanh %173 : vector<2x64xf32>
    %175 = arith.mulf %170, %174 : vector<2x64xf32>
    %cst_27 = arith.constant dense<0.000000e+00> : vector<2x256xf32>
    %176 = tpu.matmul %175, %6, %cst_27 {dimension_numbers = #tpu.dot_dimension_numbers<[1], [0], [0], [1], [0, 0, 1, 1], [], []>} : vector<2x64xf32>, vector<64x256xf32>, vector<2x256xf32> -> vector<2x256xf32>
    %177 = vector.broadcast %0 : vector<1x256xf32> to vector<2x256xf32>
    %178 = arith.addf %176, %177 : vector<2x256xf32>
    %179 = arith.negf %178 : vector<2x256xf32>
    %180 = math.exp %179 : vector<2x256xf32>
    %cst_28 = arith.constant 1.000000e+00 : f32
    %181 = vector.broadcast %cst_28 : f32 to vector<2x256xf32>
    %182 = arith.addf %181, %180 : vector<2x256xf32>
    %183 = arith.divf %181, %182 : vector<2x256xf32>
    %184 = vector.extract_strided_slice %183 {offsets = [0, 0], sizes = [2, 64], strides = [1, 1]} : vector<2x256xf32> to vector<2x64xf32>
    %185 = vector.extract_strided_slice %183 {offsets = [0, 64], sizes = [2, 64], strides = [1, 1]} : vector<2x256xf32> to vector<2x64xf32>
    %186 = vector.extract_strided_slice %178 {offsets = [0, 128], sizes = [2, 64], strides = [1, 1]} : vector<2x256xf32> to vector<2x64xf32>
    %187 = math.tanh %186 : vector<2x64xf32>
    %188 = vector.extract_strided_slice %183 {offsets = [0, 192], sizes = [2, 64], strides = [1, 1]} : vector<2x256xf32> to vector<2x64xf32>
    %189 = arith.mulf %185, %173 : vector<2x64xf32>
    %190 = arith.mulf %184, %187 : vector<2x64xf32>
    %191 = arith.addf %189, %190 : vector<2x64xf32>
    %192 = math.tanh %191 : vector<2x64xf32>
    %193 = arith.mulf %188, %192 : vector<2x64xf32>
    %c0_29 = arith.constant 0 : index
    %c0_30 = arith.constant 0 : index
    %194 = vector.load %arg4[%c0_29, %c0_30] : memref<64x128xf32, #tpu.memory_space<vmem>>, vector<64x128xf32>
    %cst_31 = arith.constant dense<0.000000e+00> : vector<2x128xf32>
    %195 = tpu.matmul %193, %194, %cst_31 {dimension_numbers = #tpu.dot_dimension_numbers<[1], [0], [0], [1], [0, 0, 1, 1], [], []>} : vector<2x64xf32>, vector<64x128xf32>, vector<2x128xf32> -> vector<2x128xf32>
    %c0_32 = arith.constant 0 : index
    %c0_33 = arith.constant 0 : index
    %196 = vector.load %arg5[%c0_32, %c0_33] : memref<1x128xf32, #tpu.memory_space<vmem>>, vector<1x128xf32>
    %197 = vector.broadcast %196 : vector<1x128xf32> to vector<2x128xf32>
    %198 = arith.addf %195, %197 : vector<2x128xf32>
    %c0_34 = arith.constant 0 : index
    %c0_35 = arith.constant 0 : index
    %199 = vector.load %arg6[%c0_34, %c0_35] : memref<2x128xf32, #tpu.memory_space<vmem>>, vector<2x128xf32>
    tpu.vector_store %arg6[%c0_34, %c0_35], %198 {strides = array<i32>} : memref<2x128xf32, #tpu.memory_space<vmem>>, vector<2x128xf32>,
    return
  }
}

</mosaic_0001>

<bundles_post_ra>
// kernel: dis_model_forward.1
= control target key start
LH: loop header
LB: loop body
LE: loop exit
PB: predicated region body
PF: predicated region fallthrough
CT: control target
= control target key end

     0   :  { %11 = vsyncpa [#allocation3], 0  ;;  %s2011_s0 = inlined_call_operand.vmem [shape: f32[16,16], index: 0, kind: input, shape index: {}]   ;;  %s2012_s1 = inlined_call_operand.hbm [shape: f32[16,256], index: 1, kind: input, shape index: {}]   ;;  %s2013_s2 = inlined_call_operand.vmem [shape: f32[1,256], index: 2, kind: input, shape index: {}]   ;;  %s2014_s3 = inlined_call_operand.hbm [shape: f32[64,256], index: 3, kind: input, shape index: {}]   ;;  %s2015_s4 = inlined_call_operand.hbm [shape: f32[64,128], index: 4, kind: input, shape index: {}]   ;;  %s2016_s5 = inlined_call_operand.vmem [shape: f32[1,128], index: 5, kind: input, shape index: {}]   ;;  %s2017_s6 = inlined_call_operand.hbm [shape: f32[2,128], index: 6, kind: output, shape index: {}]  }
   0x1   :  { %12 = vsyncpa [#allocation6], 0 }
   0x2   :  { %13 = vsyncpa [#allocation4], 0  ;;  %s1695_s21 = smov [#allocation5]   ;;  %s1696_s23 = smov [#allocation2]  }
   0x3   :  { %s35_s22 = sshll.u32 %s1695_s21, 4  ;;  %s21_s24 = sshll.u32 %s1696_s23, 4  ;;  %s36_s22 = int_to_ptr.vmem [resolvable:$true] %s35_s22  ;;  %s1742_s24 = int_to_ptr.vmem [resolvable:$true] %s21_s24 }
   0x4   :  { %s1601_s27 = scalar_lea.hbm %s2014_s3, 2048 }
   0x5   :  { %p1602_p0 = scmp.ne.s32.totalorder %s2014_s3, %s1601_s27  ;;  %p1605_p1 = scmp.lt.u32.totalorder %s1601_s27, %s2014_s3 }
   0x7   :  { %p1607_p2 = pnand %p1605_p1, %p1602_p0 }
   0x9   :  { %1610 = shalt.err (!%p1607_p2)
}
   0xa   :  { %s1611_s8 = scalar_lea.vmem %s36_s22, 2048  ;;  %p1616_p4 = scmp.lt.s32.totalorder %s36_s22, %s36_s22 }
   0xb   :  { %p1612_p3 = scmp.ne.s32.totalorder %s36_s22, %s1611_s8  ;;  %p1617_p5 = scmp.lt.s32.totalorder %s1611_s8, %s1611_s8 }
   0xd   :  { %p1618_p6 = por %p1617_p5, %p1616_p4 }
   0xf   :  { %p1619_p7 = pnand %p1618_p6, %p1612_p3 }
  0x11   :  { %1622 = shalt.err (!%p1619_p7)
}
  0x12   :  { %s1697_s9 = smov 256   ;;  %s1698_s10 = smov 16  }
  0x13   :  { %41 = dma.hbm_to_vmem [thread:$0]  %s2014_s3, 2048, %s36_s22, [#allocation6], %s1697_s9, %s1697_s9, %s1698_s10  }
  0x14   :  { %s1623_s15 = scalar_lea.hbm %s2012_s1, 512 }
  0x15   :  { %p1624_p8 = scmp.ne.s32.totalorder %s2012_s1, %s1623_s15  ;;  %p1627_p9 = scmp.lt.u32.totalorder %s1623_s15, %s2012_s1 }
  0x17   :  { %p1629_p10 = pnand %p1627_p9, %p1624_p8 }
  0x19   :  { %1632 = shalt.err (!%p1629_p10)
}
  0x1a   :  { %s1633_s20 = scalar_lea.vmem %s1742_s24, 512  ;;  %p1638_p12 = scmp.lt.s32.totalorder %s1742_s24, %s1742_s24 }
  0x1b   :  { %p1634_p11 = scmp.ne.s32.totalorder %s1742_s24, %s1633_s20  ;;  %p1639_p13 = scmp.lt.s32.totalorder %s1633_s20, %s1633_s20 }
  0x1d   :  { %p1640_p0 = por %p1639_p13, %p1638_p12 }
  0x1f   :  { %p1641_p1 = pnand %p1640_p0, %p1634_p11 }
  0x21   :  { %1644 = shalt.err (!%p1641_p1)
}
  0x22   :  { %27 = dma.hbm_to_vmem [thread:$0]  %s2012_s1, 512, %s1742_s24, [#allocation3], %s1697_s9, %s1697_s9, %s1698_s10  }
  0x23   :  { %s1699_s22 = smov [#allocation7]   ;;  %s1645_s27 = scalar_lea.hbm %s2015_s4, 1024 }
  0x24   :  { %s47_s23 = sshll.u32 %s1699_s22, 4  ;;  %p1646_p2 = scmp.ne.s32.totalorder %s2015_s4, %s1645_s27  ;;  %s48_s23 = int_to_ptr.vmem [resolvable:$true] %s47_s23 }
  0x25   :  { %p1649_p3 = scmp.lt.u32.totalorder %s1645_s27, %s2015_s4 }
  0x27   :  { %p1651_p4 = pnand %p1649_p3, %p1646_p2 }
  0x29   :  { %1654 = shalt.err (!%p1651_p4)
}
  0x2a   :  { %s1655_s8 = scalar_lea.vmem %s48_s23, 1024  ;;  %p1660_p6 = scmp.lt.s32.totalorder %s48_s23, %s48_s23 }
  0x2b   :  { %p1656_p5 = scmp.ne.s32.totalorder %s48_s23, %s1655_s8  ;;  %p1661_p7 = scmp.lt.s32.totalorder %s1655_s8, %s1655_s8 }
  0x2d   :  { %p1662_p8 = por %p1661_p7, %p1660_p6 }
  0x2f   :  { %p1663_p9 = pnand %p1662_p8, %p1656_p5 }
  0x31   :  { %1666 = shalt.err (!%p1663_p9)
}
  0x32   :  { %s1700_s1 = smov 128   ;;  %s1701_s24 = smov 8  }
  0x33   :  { %53 = dma.hbm_to_vmem [thread:$0]  %s2015_s4, 1024, %s48_s23, [#allocation6], %s1700_s1, %s1700_s1, %s1701_s24  }
  0x34   :  { %1689 = dma.done.wait [#allocation3], 512  }
  0x35   :  { %1690 = vsyncadd [#allocation3], 4294966784 }
  0x36   :  { %1691 = dma.done.wait [#allocation6], 3072  }
  0x37   :  { %1692 = vsyncadd [#allocation6], 4294964224  ;;  %v1702_v0 = vmov 0.0   ;;  %v69_v1 = vld [vmem:[#allocation2 + $0x8] sm:$0xff]  ;;  %v71_v2 = vld [vmem:[#allocation2 + $0x18] sm:$0xff]  ;;  %vm83_vm0 = vcmask 130048   ;;  %v73_v33 = vlaneseq }
  0x38   :  { %154 = vmatprep.mubr.f32.mxu0 %v1702_v0  ;;  %263 = vmatprep.mubr.f32.mxu1 %v1702_v0  ;;  %v168_v3 = vld [vmem:[#allocation5 + $0x8] sm:$0xff]  ;;  %v1321_v4 = vpack.c.bf16 %v71_v2, %v69_v1  ;;  %v170_v5 = vld [vmem:[#allocation5 + $0x18] sm:$0xff]  ;;  %v68_v6 = vld [vmem:[#allocation2] sm:$0xff]  ;;  %vm192_vm1 = vcmask 1040384   ;;  %vm195_vm3 = vcmask 523264   ;;  %vm1705_vm4 = vmmov 0  }
  0x39   :  { %v70_v7 = vld [vmem:[#allocation2 + $0x10] sm:$0xff]  ;;  %v1787_v8 = vpack.c.bf16 %v170_v5, %v168_v3  ;;  %v167_v10 = vld [vmem:[#allocation5] sm:$0xff]  ;;  %v172_v13 = vld [vmem:[#allocation5 + $0x28] sm:$0xff]  ;;  %v74_v34 = vshrl.u32 %v73_v33, 7  ;;  %s1706_s17 = smov [#allocation8]  }
  0x3a   :  { %v1323_v9 = vpack.c.bf16 %v70_v7, %v68_v6  ;;  %v169_v11 = vld [vmem:[#allocation5 + $0x10] sm:$0xff]  ;;  %1322 = vmatprep.subr.bf16.mxu0 %v1321_v4  ;;  %v174_v14 = vld [vmem:[#allocation5 + $0x38] sm:$0xff]  ;;  %v171_v15 = vld [vmem:[#allocation5 + $0x20] sm:$0xff]  ;;  %s1253_s18 = sshll.u32 %s1706_s17, 4  ;;  %s1254_s18 = int_to_ptr.vmem [resolvable:$true] %s1253_s18 }
  0x3b   :  { %v1789_v12 = vpack.c.bf16 %v169_v11, %v167_v10  ;;  %1326 = vmatprep.subr.bf16.mxu1 %v1787_v8  ;;  %v66_v16 = vld [vmem:[%s2011_s0] sm:$0xff]  ;;  %v1795_v17 = vpack.c.bf16 %v174_v14, %v172_v13  ;;  %v173_v18 = vld [vmem:[#allocation5 + $0x30] sm:$0xff]  ;;  %v176_v19 = vld [vmem:[#allocation5 + $0x48] sm:$0xff]  ;;  %v75_v35 = vsub.s32 0, %v74_v34  ;;  %v79_v37 = vsub.s32 1, %v74_v34  ;;  %s1667_s19 = scalar_lea.vmem %s1254_s18, 32  ;;  %p1672_p11 = scmp.lt.s32.totalorder %s1254_s18, %s1254_s18 }
  0x3c   :  { %1324 = vmatpush1.bf16.msra.mxu0 %v1323_v9  ;;  %v1798_v20 = vpack.c.bf16 %v173_v18, %v171_v15  ;;  %v178_v21 = vld [vmem:[#allocation5 + $0x58] sm:$0xff]  ;;  %v175_v23 = vld [vmem:[#allocation5 + $0x40] sm:$0xff]  ;;  %v177_v24 = vld [vmem:[#allocation5 + $0x50] sm:$0xff]  ;;  %p1668_p10 = scmp.ne.s32.totalorder %s1254_s18, %s1667_s19  ;;  %p1673_p12 = scmp.lt.s32.totalorder %s1667_s19, %s1667_s19 }
  0x3d   :  { %1328 = vmatpush1.bf16.msra.mxu1 %v1789_v12  ;;  %1342 = vmatprep.subr.bf16.mxu0 %v1787_v8  ;;  %v1802_v22 = vpack.c.bf16 %v178_v21, %v176_v19  ;;  %v180_v25 = vld [vmem:[#allocation5 + $0x68] sm:$0xff]  ;;  %v182_v26 = vld [vmem:[#allocation5 + $0x78] sm:$0xff]  ;;  %v1811_v28 = vpack.c.bf16 %v177_v24, %v175_v23  ;;  %v179_v30 = vld [vmem:[#allocation5 + $0x60] sm:$0xff] }
  0x3e   :  { %1330 = vmatprep.subr.bf16.mxu1 %v1795_v17  ;;  %v67_v27 = vld [vmem:[%s2011_s0 + $0x8] sm:$0xff]  ;;  %v1815_v29 = vpack.c.bf16 %v182_v26, %v180_v25  ;;  %v181_v31 = vld [vmem:[#allocation5 + $0x70] sm:$0xff]  ;;  %v65_v36 = vld [vmem:[%s2013_s2] sm:$0x3]  ;;  %s1703_s2 = smov 64   ;;  %p1674_p13 = por %p1673_p12, %p1672_p11 }
  0x3f   :  { %1263 = vmatmul.mubr.msk.f32.vlgmr.msra.gmra.mrb[0].mxu0 %vm83_vm0, %v66_v16  ;;  %v1821_v32 = vpack.c.bf16 %v181_v31, %v179_v30  ;;  %v1845_v38 = vrot.slane %v65_v36, %v75_v35  ;;  %v1847_v39 = vrot.slane %v65_v36, %v79_v37 }
  0x40   :  { %160 = vmatprep.mubr.f32.mxu0 %v1702_v0  ;;  %1344 = vmatpush1.bf16.msra.mxu0 %v1789_v12  ;;  %p1675_p0 = pnand %p1674_p13, %p1668_p10 }
  0x41   :  { %1332 = vmatpush1.bf16.msra.mxu1 %v1798_v20  ;;  %1346 = vmatprep.subr.bf16.mxu0 %v1795_v17 }
  0x42   :  { %1334 = vmatprep.subr.bf16.mxu1 %v1802_v22 }
  0x43   :  { %1264 = vmatmul.mubr.msk.f32.gmra.mrb[2].mxu0 %vm83_vm0, %v67_v27 }
  0x44   :  { %1348 = vmatpush1.bf16.msra.mxu0 %v1798_v20  ;;  %377 = vmatprep.mubr.f32.mxu0 %v1702_v0 }
  0x45   :  { %1336 = vmatpush1.bf16.msra.mxu1 %v1811_v28  ;;  %1350 = vmatprep.subr.bf16.mxu0 %v1802_v22 }
  0x46   :  { %1338 = vmatprep.subr.bf16.mxu1 %v1815_v29 }
  0x48   :  { %1352 = vmatpush1.bf16.msra.mxu0 %v1811_v28 }
  0x49   :  { %1340 = vmatpush1.bf16.msra.mxu1 %v1821_v32  ;;  %1354 = vmatprep.subr.bf16.mxu0 %v1815_v29 }
  0x4a   :  { %1358 = vmatprep.subr.bf16.mxu1 %v1787_v8 }
  0x4c   :  { %264 = vmatmul.mubr.f32.vlgmr.msra.gmra.mrb[0].mxu1 %v1702_v0  ;;  %1356 = vmatpush1.bf16.msra.mxu0 %v1821_v32 }
  0x4d   :  { %1360 = vmatpush1.bf16.msra.mxu1 %v1789_v12  ;;  %489 = vmatprep.mubr.f32.mxu1 %v1702_v0 }
  0x4e   :  { %1362 = vmatprep.subr.bf16.mxu1 %v1795_v17  ;;  %1374 = vmatprep.subr.bf16.mxu0 %v1787_v8 }
  0x51   :  { %1364 = vmatpush1.bf16.msra.mxu1 %v1798_v20 }
  0x52   :  { %1366 = vmatprep.subr.bf16.mxu1 %v1802_v22 }
  0x55   :  { %1368 = vmatpush1.bf16.msra.mxu1 %v1811_v28 }
  0x56   :  { %1370 = vmatprep.subr.bf16.mxu1 %v1815_v29 }
  0x59   :  { %1372 = vmatpush1.bf16.msra.mxu1 %v1821_v32 }
  0x5a   :  { %1390 = vmatprep.subr.bf16.mxu1 %v1787_v8 }
 0x112   :  { %v156_v40 = vpop.f32.mrb[0].mxu0 }
 0x113   :  { %v157_v41 = vadd.f32 %v156_v40, %v1845_v38  ;;  %v158_v42 = vpop.f32.mrb[1].mxu0 }
 0x114   :  { %v159_v43 = vadd.f32 %v158_v42, %v1847_v39 }
 0x115   :  { %v304_v44 = vrot.slane %v157_v41, 1  ;;  %v410_v45 = vrot.slane %v157_v41, 2  ;;  %v518_v46 = vrot.slane %v157_v41, 3  ;;  %v626_v47 = vrot.slane %v157_v41, 4 }
 0x116   :  { %v162_v48 = vpop.f32.mrb[2].mxu0  ;;  %v305_v49 = vrot.slane %v159_v43, 1  ;;  %v411_v50 = vrot.slane %v159_v43, 2  ;;  %v519_v51 = vrot.slane %v159_v43, 3  ;;  %v627_v52 = vrot.slane %v159_v43, 4 }
 0x117   :  { %v163_v53 = vadd.f32 %v162_v48, %v1845_v38  ;;  %v164_v54 = vpop.f32.mrb[3].mxu0  ;;  %v734_v55 = vrot.slane %v157_v41, 5  ;;  %v735_v56 = vrot.slane %v159_v43, 5  ;;  %v842_v57 = vrot.slane %v157_v41, 6 }
 0x118   :  { %v165_v58 = vadd.f32 %v164_v54, %v1847_v39  ;;  %v843_v59 = vrot.slane %v159_v43, 6  ;;  %v950_v60 = vrot.slane %v157_v41, 7  ;;  %v951_v61 = vrot.slane %v159_v43, 7 }
 0x119   :  { %v188_v62 = vrot.slane %v163_v53, 7  ;;  %v1854_v63 = vsel %vm192_vm1, %v304_v44, %v163_v53  ;;  %v414_v1 = vrot.slane %v163_v53, 1  ;;  %v522_v2 = vrot.slane %v163_v53, 2 }
 0x11a   :  { %v189_v3 = vrot.slane %v165_v58, 7  ;;  %v1857_v4 = vsel %vm192_vm1, %v305_v49, %v165_v58  ;;  %v415_v5 = vrot.slane %v165_v58, 1  ;;  %v523_v6 = vrot.slane %v165_v58, 2 }
 0x11b   :  { %v193_v7 = vsel %vm192_vm1, %v157_v41, %v188_v62  ;;  %v1861_v9 = vsel %vm192_vm1, %v410_v45, %v414_v1  ;;  %v1864_v10 = vsel %vm192_vm1, %v518_v46, %v522_v2  ;;  %v630_v11 = vrot.slane %v163_v53, 3 }
 0x11c   :  { %v194_v13 = vsel %vm192_vm1, %v159_v43, %v189_v3  ;;  %v1868_v14 = vsel %vm192_vm1, %v411_v50, %v415_v5  ;;  %v1871_v15 = vsel %vm192_vm1, %v519_v51, %v523_v6  ;;  %v631_v16 = vrot.slane %v165_v58, 3 }
 0x11d   :  { %v1874_v18 = vsel %vm192_vm1, %v626_v47, %v630_v11  ;;  %v738_v19 = vrot.slane %v163_v53, 4  ;;  %v739_v21 = vrot.slane %v165_v58, 4  ;;  %v846_v23 = vrot.slane %v163_v53, 5 }
 0x11e   :  { %v1877_v24 = vsel %vm192_vm1, %v627_v52, %v631_v16  ;;  %v847_v25 = vrot.slane %v165_v58, 5  ;;  %v954_v26 = vrot.slane %v163_v53, 6  ;;  %v955_v27 = vrot.slane %v165_v58, 6 }
 0x11f   :  { %v265_v30 = vpop.f32.mrb[0].mxu1  ;;  %v1880_v31 = vsel %vm192_vm1, %v734_v55, %v738_v19  ;;  %v1883_v34 = vsel %vm192_vm1, %v735_v56, %v739_v21  ;;  %v1886_v35 = vsel %vm192_vm1, %v842_v57, %v846_v23 }
 0x120   :  { %v266_v36 = vadd.f32 %v265_v30, %v193_v7  ;;  %v267_v37 = vpop.f32.mrb[1].mxu1  ;;  %v1889_v40 = vsel %vm192_vm1, %v843_v59, %v847_v25  ;;  %v1892_v41 = vsel %vm192_vm1, %v950_v60, %v954_v26  ;;  %v1895_v42 = vsel %vm192_vm1, %v951_v61, %v955_v27 }
 0x121   :  { %v268_v43 = vadd.f32 %v267_v37, %v194_v13  ;;  %v184_v59 = vand.u32 127, %v73_v33 }
 0x122   :  { %v1265_v44 = vmul.f32 -1.442695, %v266_v36 }
 0x123   :  { %v1266_v50 = vmul.f32 -1.442695, %v268_v43  ;;  %vm185_vm2 = vcmp.lt.s32.totalorder %v184_v59, 32 }
 0x124   :  { %1493 = vpow2.f32 %v1265_v44 }
 0x125   :  { %1495 = vtanh.f32 %v268_v43 }
 0x12e   :  { %v1494_v45 = vpop.eup %1493 }
 0x12f   :  { %v276_v46 = vadd.f32 1.0, %v1494_v45  ;;  %v1496_v47 = vpop.eup %1495 }
 0x131   :  { %1497 = vrcp.f32 %v276_v46 }
 0x132   :  { %1499 = vpow2.f32 %v1266_v50 }
 0x13b   :  { %v1498_v48 = vpop.eup %1497 }
 0x13c   :  { %v284_v49 = vmul.f32 %v1498_v48, %v1496_v47  ;;  %v1500_v51 = vpop.eup %1499  ;;  %v283_v53 = vmul.f32 0.0, %v1498_v48 }
 0x13d   :  { %v277_v52 = vadd.f32 1.0, %v1500_v51 }
 0x13e   :  { %286 = vrot.lane.b32.xlu0 %v284_v49, %s1703_s2 }
 0x13f   :  { %1501 = vrcp.f32 %v277_v52 }
 0x149   :  { %v1502_v56 = vpop.eup %1501 }
 0x1b0   :  { %v287_v54 = vpop.permute.xlu0 %286 }
 0x1b1   :  { %v289_v55 = vadd.f32 %v287_v54, %v283_v53 }
 0x1b3   :  { %1503 = vtanh.f32 %v289_v55  ;;  %298 = vrot.lane.b32.xlu1 %v289_v55, %s1703_s2 }
 0x1bd   :  { %v1504_v57 = vpop.eup %1503 }
 0x1be   :  { %v291_v58 = vmul.f32 %v1504_v57, %v1502_v56 }
 0x1c0   :  { %293 = vrot.lane.b32.xlu0 %v291_v58, %s1703_s2 }
 0x225   :  { %v299_v60 = vpop.permute.xlu1 %298 }
 0x226   :  { %v301_v61 = vsel %vm185_vm2, %v299_v60, 0.0 }
 0x227   :  { %398 = vrot.lane.b32.xlu1 %v301_v61, %s1703_s2 }
 0x232   :  { %v294_v62 = vpop.permute.xlu0 %293 }
 0x233   :  { %v296_v1 = vsel %vm185_vm2, %v294_v62, 0.0 }
 0x234   :  { %1267 = vmatmul.mubr.msk.f32.vlgmr.msra.gmra.mrb[4].mxu0 %vm195_vm3, %v296_v1 }
 0x235   :  { %1376 = vmatpush1.bf16.msra.mxu0 %v1789_v12  ;;  %597 = vmatprep.mubr.f32.mxu0 %v1702_v0 }
 0x236   :  { %1378 = vmatprep.subr.bf16.mxu0 %v1795_v17 }
 0x239   :  { %1380 = vmatpush1.bf16.msra.mxu0 %v1798_v20 }
 0x23a   :  { %1382 = vmatprep.subr.bf16.mxu0 %v1802_v22 }
 0x23d   :  { %1384 = vmatpush1.bf16.msra.mxu0 %v1811_v28 }
 0x23e   :  { %1386 = vmatprep.subr.bf16.mxu0 %v1815_v29 }
 0x241   :  { %1388 = vmatpush1.bf16.msra.mxu0 %v1821_v32 }
 0x242   :  { %1406 = vmatprep.subr.bf16.mxu0 %v1787_v8 }
 0x299   :  { %v399_v25 = vpop.permute.xlu1 %398 }
 0x307   :  { %v379_v33 = vpop.f32.mrb[4].mxu0 }
 0x308   :  { %v380_v2 = vadd.f32 %v379_v33, %v1854_v63  ;;  %v381_v3 = vpop.f32.mrb[5].mxu0 }
 0x309   :  { %v382_v5 = vadd.f32 %v381_v3, %v1857_v4 }
 0x30a   :  { %v1268_v6 = vmul.f32 -1.442695, %v380_v2 }
 0x30b   :  { %v1269_v21 = vmul.f32 -1.442695, %v382_v5 }
 0x30c   :  { %1505 = vpow2.f32 %v1268_v6 }
 0x30d   :  { %1507 = vtanh.f32 %v382_v5 }
 0x316   :  { %v1506_v7 = vpop.eup %1505 }
 0x317   :  { %v390_v11 = vadd.f32 1.0, %v1506_v7  ;;  %v1508_v13 = vpop.eup %1507 }
 0x319   :  { %1509 = vrcp.f32 %v390_v11 }
 0x31a   :  { %1511 = vpow2.f32 %v1269_v21 }
 0x323   :  { %v1510_v16 = vpop.eup %1509 }
 0x324   :  { %v402_v19 = vmul.f32 %v1510_v16, %v1508_v13  ;;  %v1512_v23 = vpop.eup %1511  ;;  %v401_v63 = vmul.f32 %v1510_v16, %v399_v25 }
 0x325   :  { %v391_v26 = vadd.f32 1.0, %v1512_v23 }
 0x326   :  { %404 = vrot.lane.b32.xlu0 %v402_v19, %s1703_s2 }
 0x327   :  { %1513 = vrcp.f32 %v391_v26 }
 0x331   :  { %v1514_v4 = vpop.eup %1513 }
 0x398   :  { %v405_v27 = vpop.permute.xlu0 %404 }
 0x399   :  { %v407_v30 = vadd.f32 %v405_v27, %v401_v63 }
 0x39b   :  { %1515 = vtanh.f32 %v407_v30 }
 0x3a5   :  { %v1516_v36 = vpop.eup %1515 }
 0x3a6   :  { %v409_v37 = vmul.f32 %v1516_v36, %v1514_v4 }
 0x3a8   :  { %421 = vrot.lane.b32.xlu1 %v409_v37, %s1703_s2 }
 0x41a   :  { %v422_v43 = vpop.permute.xlu1 %421 }
 0x41b   :  { %1270 = vmatmul.mubr.msk.f32.vlgmr.msra.gmra.mrb[2].mxu1 %vm195_vm3, %v422_v43 }
 0x41c   :  { %1392 = vmatpush1.bf16.msra.mxu1 %v1789_v12  ;;  %705 = vmatprep.mubr.f32.mxu1 %v1702_v0 }
 0x41d   :  { %1394 = vmatprep.subr.bf16.mxu1 %v1795_v17 }
 0x420   :  { %1396 = vmatpush1.bf16.msra.mxu1 %v1798_v20 }
 0x421   :  { %1398 = vmatprep.subr.bf16.mxu1 %v1802_v22 }
 0x424   :  { %1400 = vmatpush1.bf16.msra.mxu1 %v1811_v28 }
 0x425   :  { %1402 = vmatprep.subr.bf16.mxu1 %v1815_v29 }
 0x428   :  { %1404 = vmatpush1.bf16.msra.mxu1 %v1821_v32 }
 0x429   :  { %1422 = vmatprep.subr.bf16.mxu1 %v1787_v8 }
 0x4ee   :  { %v491_v44 = vpop.f32.mrb[2].mxu1 }
 0x4ef   :  { %v492_v45 = vadd.f32 %v491_v44, %v1861_v9  ;;  %v493_v46 = vpop.f32.mrb[3].mxu1 }
 0x4f0   :  { %v494_v47 = vadd.f32 %v493_v46, %v1868_v14 }
 0x4f1   :  { %v1271_v48 = vmul.f32 -1.442695, %v492_v45 }
 0x4f2   :  { %v1272_v54 = vmul.f32 -1.442695, %v494_v47 }
 0x4f3   :  { %1517 = vpow2.f32 %v1271_v48 }
 0x4f4   :  { %1519 = vtanh.f32 %v494_v47 }
 0x4fd   :  { %v1518_v49 = vpop.eup %1517 }
 0x4fe   :  { %v502_v50 = vadd.f32 1.0, %v1518_v49  ;;  %v1520_v51 = vpop.eup %1519 }
 0x500   :  { %1521 = vrcp.f32 %v502_v50 }
 0x501   :  { %1523 = vpow2.f32 %v1272_v54 }
 0x50a   :  { %v1522_v52 = vpop.eup %1521 }
 0x50b   :  { %v510_v53 = vmul.f32 %v1522_v52, %v1520_v51  ;;  %v1524_v55 = vpop.eup %1523  ;;  %v509_v57 = vmul.f32 %v1522_v52, %v407_v30 }
 0x50c   :  { %v503_v56 = vadd.f32 1.0, %v1524_v55 }
 0x50d   :  { %512 = vrot.lane.b32.xlu0 %v510_v53, %s1703_s2 }
 0x50e   :  { %1525 = vrcp.f32 %v503_v56 }
 0x518   :  { %v1526_v14 = vpop.eup %1525 }
 0x57f   :  { %v513_v9 = vpop.permute.xlu0 %512 }
 0x580   :  { %v515_v58 = vadd.f32 %v513_v9, %v509_v57 }
 0x582   :  { %1527 = vtanh.f32 %v515_v58 }
 0x58c   :  { %v1528_v59 = vpop.eup %1527 }
 0x58d   :  { %v517_v60 = vmul.f32 %v1528_v59, %v1526_v14 }
 0x58f   :  { %529 = vrot.lane.b32.xlu1 %v517_v60, %s1703_s2 }
 0x601   :  { %v530_v61 = vpop.permute.xlu1 %529 }
 0x602   :  { %1273 = vmatmul.mubr.msk.f32.vlgmr.msra.gmra.mrb[6].mxu0 %vm195_vm3, %v530_v61 }
 0x603   :  { %1408 = vmatpush1.bf16.msra.mxu0 %v1789_v12  ;;  %813 = vmatprep.mubr.f32.mxu0 %v1702_v0 }
 0x604   :  { %1410 = vmatprep.subr.bf16.mxu0 %v1795_v17 }
 0x607   :  { %1412 = vmatpush1.bf16.msra.mxu0 %v1798_v20 }
 0x608   :  { %1414 = vmatprep.subr.bf16.mxu0 %v1802_v22 }
 0x60b   :  { %1416 = vmatpush1.bf16.msra.mxu0 %v1811_v28 }
 0x60c   :  { %1418 = vmatprep.subr.bf16.mxu0 %v1815_v29 }
 0x60f   :  { %1420 = vmatpush1.bf16.msra.mxu0 %v1821_v32 }
 0x610   :  { %1438 = vmatprep.subr.bf16.mxu0 %v1787_v8 }
 0x6d5   :  { %v599_v62 = vpop.f32.mrb[6].mxu0 }
 0x6d6   :  { %v600_v1 = vadd.f32 %v599_v62, %v1864_v10  ;;  %v601_v33 = vpop.f32.mrb[7].mxu0 }
 0x6d7   :  { %v602_v2 = vadd.f32 %v601_v33, %v1871_v15 }
 0x6d8   :  { %v1274_v3 = vmul.f32 -1.442695, %v600_v1 }
 0x6d9   :  { %v1275_v16 = vmul.f32 -1.442695, %v602_v2 }
 0x6da   :  { %1529 = vpow2.f32 %v1274_v3 }
 0x6db   :  { %1531 = vtanh.f32 %v602_v2 }
 0x6e4   :  { %v1530_v5 = vpop.eup %1529 }
 0x6e5   :  { %v610_v6 = vadd.f32 1.0, %v1530_v5  ;;  %v1532_v7 = vpop.eup %1531 }
 0x6e7   :  { %1533 = vrcp.f32 %v610_v6 }
 0x6e8   :  { %1535 = vpow2.f32 %v1275_v16 }
 0x6f1   :  { %v1534_v11 = vpop.eup %1533 }
 0x6f2   :  { %v618_v13 = vmul.f32 %v1534_v11, %v1532_v7  ;;  %v1536_v19 = vpop.eup %1535  ;;  %v617_v23 = vmul.f32 %v1534_v11, %v515_v58 }
 0x6f3   :  { %v611_v21 = vadd.f32 1.0, %v1536_v19 }
 0x6f4   :  { %620 = vrot.lane.b32.xlu0 %v618_v13, %s1703_s2 }
 0x6f5   :  { %1537 = vrcp.f32 %v611_v21 }
 0x6ff   :  { %v1538_v15 = vpop.eup %1537 }
 0x766   :  { %v621_v10 = vpop.permute.xlu0 %620 }
 0x767   :  { %v623_v25 = vadd.f32 %v621_v10, %v617_v23 }
 0x769   :  { %1539 = vtanh.f32 %v623_v25 }
 0x773   :  { %v1540_v26 = vpop.eup %1539 }
 0x774   :  { %v625_v63 = vmul.f32 %v1540_v26, %v1538_v15 }
 0x776   :  { %637 = vrot.lane.b32.xlu1 %v625_v63, %s1703_s2 }
 0x7e8   :  { %v638_v27 = vpop.permute.xlu1 %637 }
 0x7e9   :  { %1276 = vmatmul.mubr.msk.f32.vlgmr.msra.gmra.mrb[4].mxu1 %vm195_vm3, %v638_v27 }
 0x7ea   :  { %1424 = vmatpush1.bf16.msra.mxu1 %v1789_v12  ;;  %921 = vmatprep.mubr.f32.mxu1 %v1702_v0 }
 0x7eb   :  { %1426 = vmatprep.subr.bf16.mxu1 %v1795_v17 }
 0x7ee   :  { %1428 = vmatpush1.bf16.msra.mxu1 %v1798_v20 }
 0x7ef   :  { %1430 = vmatprep.subr.bf16.mxu1 %v1802_v22 }
 0x7f2   :  { %1432 = vmatpush1.bf16.msra.mxu1 %v1811_v28 }
 0x7f3   :  { %1434 = vmatprep.subr.bf16.mxu1 %v1815_v29 }
 0x7f6   :  { %1436 = vmatpush1.bf16.msra.mxu1 %v1821_v32 }
 0x7f7   :  { %1454 = vmatprep.subr.bf16.mxu1 %v1787_v8 }
 0x8bc   :  { %v707_v30 = vpop.f32.mrb[4].mxu1 }
 0x8bd   :  { %v708_v4 = vadd.f32 %v707_v30, %v1874_v18  ;;  %v709_v36 = vpop.f32.mrb[5].mxu1 }
 0x8be   :  { %v710_v37 = vadd.f32 %v709_v36, %v1877_v24 }
 0x8bf   :  { %v1277_v43 = vmul.f32 -1.442695, %v708_v4 }
 0x8c0   :  { %v1278_v49 = vmul.f32 -1.442695, %v710_v37 }
 0x8c1   :  { %1541 = vpow2.f32 %v1277_v43 }
 0x8c2   :  { %1543 = vtanh.f32 %v710_v37 }
 0x8cb   :  { %v1542_v44 = vpop.eup %1541 }
 0x8cc   :  { %v718_v45 = vadd.f32 1.0, %v1542_v44  ;;  %v1544_v46 = vpop.eup %1543 }
 0x8ce   :  { %1545 = vrcp.f32 %v718_v45 }
 0x8cf   :  { %1547 = vpow2.f32 %v1278_v49 }
 0x8d8   :  { %v1546_v47 = vpop.eup %1545 }
 0x8d9   :  { %v726_v48 = vmul.f32 %v1546_v47, %v1544_v46  ;;  %v1548_v8 = vpop.eup %1547  ;;  %v725_v51 = vmul.f32 %v1546_v47, %v623_v25 }
 0x8da   :  { %v719_v50 = vadd.f32 1.0, %v1548_v8 }
 0x8db   :  { %728 = vrot.lane.b32.xlu0 %v726_v48, %s1703_s2 }
 0x8dc   :  { %1549 = vrcp.f32 %v719_v50 }
 0x8e6   :  { %v1550_v24 = vpop.eup %1549 }
 0x94d   :  { %v729_v18 = vpop.permute.xlu0 %728 }
 0x94e   :  { %v731_v52 = vadd.f32 %v729_v18, %v725_v51 }
 0x950   :  { %1551 = vtanh.f32 %v731_v52 }
 0x95a   :  { %v1552_v53 = vpop.eup %1551 }
 0x95b   :  { %v733_v54 = vmul.f32 %v1552_v53, %v1550_v24 }
 0x95d   :  { %745 = vrot.lane.b32.xlu1 %v733_v54, %s1703_s2 }
 0x9cf   :  { %v746_v55 = vpop.permute.xlu1 %745 }
 0x9d0   :  { %1279 = vmatmul.mubr.msk.f32.vlgmr.msra.gmra.mrb[8].mxu0 %vm195_vm3, %v746_v55 }
 0x9d1   :  { %1440 = vmatpush1.bf16.msra.mxu0 %v1789_v12  ;;  %1029 = vmatprep.mubr.f32.mxu0 %v1702_v0 }
 0x9d2   :  { %1442 = vmatprep.subr.bf16.mxu0 %v1795_v17 }
 0x9d5   :  { %1444 = vmatpush1.bf16.msra.mxu0 %v1798_v20 }
 0x9d6   :  { %1446 = vmatprep.subr.bf16.mxu0 %v1802_v22 }
 0x9d9   :  { %1448 = vmatpush1.bf16.msra.mxu0 %v1811_v28 }
 0x9da   :  { %1450 = vmatprep.subr.bf16.mxu0 %v1815_v29 }
 0x9dd   :  { %1452 = vmatpush1.bf16.msra.mxu0 %v1821_v32 }
 0xaa3   :  { %v815_v56 = vpop.f32.mrb[8].mxu0 }
 0xaa4   :  { %v816_v57 = vadd.f32 %v815_v56, %v1880_v31  ;;  %v817_v9 = vpop.f32.mrb[9].mxu0 }
 0xaa5   :  { %v818_v58 = vadd.f32 %v817_v9, %v1883_v34 }
 0xaa6   :  { %v1280_v14 = vmul.f32 -1.442695, %v816_v57 }
 0xaa7   :  { %v1281_v33 = vmul.f32 -1.442695, %v818_v58 }
 0xaa8   :  { %1553 = vpow2.f32 %v1280_v14 }
 0xaa9   :  { %1555 = vtanh.f32 %v818_v58 }
 0xab2   :  { %v1554_v59 = vpop.eup %1553 }
 0xab3   :  { %v826_v60 = vadd.f32 1.0, %v1554_v59  ;;  %v1556_v61 = vpop.eup %1555 }
 0xab5   :  { %1557 = vrcp.f32 %v826_v60 }
 0xab6   :  { %1559 = vpow2.f32 %v1281_v33  ;;  %v1157_v33 = vld [vmem:[#allocation7 + $0x8] sm:$0xff] }
 0xabf   :  { %v1558_v62 = vpop.eup %1557 }
 0xac0   :  { %v834_v1 = vmul.f32 %v1558_v62, %v1556_v61  ;;  %v1560_v2 = vpop.eup %1559  ;;  %v833_v5 = vmul.f32 %v1558_v62, %v731_v52 }
 0xac1   :  { %v827_v3 = vadd.f32 1.0, %v1560_v2  ;;  %v1158_v2 = vld [vmem:[#allocation7 + $0x10] sm:$0xff] }
 0xac2   :  { %836 = vrot.lane.b32.xlu0 %v834_v1, %s1703_s2  ;;  %v1156_v1 = vld [vmem:[#allocation7] sm:$0xff] }
 0xac3   :  { %1561 = vrcp.f32 %v827_v3  ;;  %v1704_v3 = vmov 0.0|0.0  }
 0xac4   :  { %1469 = vmatprep.subr.bf16.mxu0 %v1704_v3 }
 0xacd   :  { %v1562_v34 = vpop.eup %1561 }
 0xb34   :  { %v837_v31 = vpop.permute.xlu0 %836 }
 0xb35   :  { %v839_v6 = vadd.f32 %v837_v31, %v833_v5  ;;  %v1159_v5 = vld [vmem:[#allocation7 + $0x18] sm:$0xff]  ;;  %v1160_v31 = vld [vmem:[#allocation7 + $0x20] sm:$0xff] }
 0xb37   :  { %1563 = vtanh.f32 %v839_v6 }
 0xb41   :  { %v1564_v7 = vpop.eup %1563 }
 0xb42   :  { %v841_v11 = vmul.f32 %v1564_v7, %v1562_v34  ;;  %v1162_v7 = vld [vmem:[#allocation7 + $0x30] sm:$0xff] }
 0xb44   :  { %853 = vrot.lane.b32.xlu1 %v841_v11, %s1703_s2  ;;  %v1163_v11 = vld [vmem:[#allocation7 + $0x38] sm:$0xff] }
 0xbb6   :  { %v854_v13 = vpop.permute.xlu1 %853 }
 0xbb7   :  { %1282 = vmatmul.mubr.msk.f32.vlgmr.msra.gmra.mrb[6].mxu1 %vm195_vm3, %v854_v13  ;;  %v1479_v13 = vpack.c.bf16 %v1163_v11, %v1162_v7 }
 0xbb8   :  { %1456 = vmatpush1.bf16.msra.mxu1 %v1789_v12  ;;  %1127 = vmatprep.mubr.f32.mxu1 %v1702_v0 }
 0xbb9   :  { %1458 = vmatprep.subr.bf16.mxu1 %v1795_v17 }
 0xbbc   :  { %1460 = vmatpush1.bf16.msra.mxu1 %v1798_v20 }
 0xbbd   :  { %1462 = vmatprep.subr.bf16.mxu1 %v1802_v22 }
 0xbc0   :  { %1464 = vmatpush1.bf16.msra.mxu1 %v1811_v28 }
 0xbc1   :  { %1466 = vmatprep.subr.bf16.mxu1 %v1815_v29 }
 0xbc4   :  { %1468 = vmatpush1.bf16.msra.mxu1 %v1821_v32 }
 0xc8a   :  { %v923_v16 = vpop.f32.mrb[6].mxu1 }
 0xc8b   :  { %v924_v19 = vadd.f32 %v923_v16, %v1886_v35  ;;  %v925_v21 = vpop.f32.mrb[7].mxu1 }
 0xc8c   :  { %v926_v12 = vadd.f32 %v925_v21, %v1889_v40 }
 0xc8d   :  { %v1283_v23 = vmul.f32 -1.442695, %v924_v19 }
 0xc8e   :  { %v1284_v28 = vmul.f32 -1.442695, %v926_v12 }
 0xc8f   :  { %1565 = vpow2.f32 %v1283_v23 }
 0xc90   :  { %1567 = vtanh.f32 %v926_v12 }
 0xc99   :  { %v1566_v10 = vpop.eup %1565 }
 0xc9a   :  { %v934_v17 = vadd.f32 1.0, %v1566_v10  ;;  %v1568_v20 = vpop.eup %1567 }
 0xc9c   :  { %1569 = vrcp.f32 %v934_v17 }
 0xc9d   :  { %1571 = vpow2.f32 %v1284_v28 }
 0xca6   :  { %v1570_v22 = vpop.eup %1569 }
 0xca7   :  { %v942_v25 = vmul.f32 %v1570_v22, %v1568_v20  ;;  %v1572_v29 = vpop.eup %1571  ;;  %v941_v15 = vmul.f32 %v1570_v22, %v839_v6  ;;  %v1161_v6 = vld [vmem:[#allocation7 + $0x28] sm:$0xff] }
 0xca8   :  { %v935_v32 = vadd.f32 1.0, %v1572_v29  ;;  %v1476_v34 = vpack.c.bf16 %v1161_v6, %v1160_v31 }
 0xca9   :  { %944 = vrot.lane.b32.xlu0 %v942_v25, %s1703_s2  ;;  %v1291_v25 = vld [vmem:[%s2016_s5] ss:$0 sm:$0xff] }
 0xcaa   :  { %1573 = vrcp.f32 %v935_v32 }
 0xcb4   :  { %v1574_v40 = vpop.eup %1573 }
 0xd1b   :  { %v945_v35 = vpop.permute.xlu0 %944 }
 0xd1c   :  { %v947_v26 = vadd.f32 %v945_v35, %v941_v15 }
 0xd1e   :  { %1575 = vtanh.f32 %v947_v26 }
 0xd28   :  { %v1576_v63 = vpop.eup %1575 }
 0xd29   :  { %v949_v27 = vmul.f32 %v1576_v63, %v1574_v40 }
 0xd2b   :  { %961 = vrot.lane.b32.xlu1 %v949_v27, %s1703_s2 }
 0xd9d   :  { %v962_v30 = vpop.permute.xlu1 %961 }
 0xd9e   :  { %1285 = vmatmul.mubr.msk.f32.vlgmr.msra.gmra.mrb[10].mxu0 %vm195_vm3, %v962_v30 }
 0xd9f   :  { %1318 = vmatprep.mubr.msk.f32.mxu0 %vm1705_vm4, %v1702_v0 }
 0xe71   :  { %v1031_v4 = vpop.f32.mrb[10].mxu0 }
 0xe72   :  { %v1032_v36 = vadd.f32 %v1031_v4, %v1892_v41  ;;  %v1033_v37 = vpop.f32.mrb[11].mxu0 }
 0xe73   :  { %v1034_v43 = vadd.f32 %v1033_v37, %v1895_v42 }
 0xe74   :  { %v1286_v44 = vmul.f32 -1.442695, %v1032_v36 }
 0xe75   :  { %v1287_v8 = vmul.f32 -1.442695, %v1034_v43 }
 0xe76   :  { %1577 = vpow2.f32 %v1286_v44 }
 0xe77   :  { %1579 = vtanh.f32 %v1034_v43 }
 0xe80   :  { %v1578_v45 = vpop.eup %1577 }
 0xe81   :  { %v1042_v46 = vadd.f32 1.0, %v1578_v45  ;;  %v1580_v47 = vpop.eup %1579 }
 0xe83   :  { %1581 = vrcp.f32 %v1042_v46 }
 0xe84   :  { %1583 = vpow2.f32 %v1287_v8 }
 0xe8d   :  { %v1582_v48 = vpop.eup %1581 }
 0xe8e   :  { %v1050_v49 = vmul.f32 %v1582_v48, %v1580_v47  ;;  %v1584_v50 = vpop.eup %1583  ;;  %v1049_v18 = vmul.f32 %v1582_v48, %v947_v26 }
 0xe8f   :  { %v1043_v51 = vadd.f32 1.0, %v1584_v50 }
 0xe90   :  { %1052 = vrot.lane.b32.xlu0 %v1050_v49, %s1703_s2 }
 0xe91   :  { %1585 = vrcp.f32 %v1043_v51 }
 0xe9b   :  { %v1586_v42 = vpop.eup %1585 }
 0xf02   :  { %v1053_v41 = vpop.permute.xlu0 %1052 }
 0xf03   :  { %v1055_v52 = vadd.f32 %v1053_v41, %v1049_v18 }
 0xf05   :  { %1587 = vtanh.f32 %v1055_v52 }
 0xf0f   :  { %v1588_v24 = vpop.eup %1587 }
 0xf10   :  { %v1057_v53 = vmul.f32 %v1588_v24, %v1586_v42 }
 0xf12   :  { %1059 = vrot.lane.b32.xlu1 %v1057_v53, %s1703_s2 }
 0xf84   :  { %v1060_v54 = vpop.permute.xlu1 %1059 }
 0xf85   :  { %1288 = vmatmul.mubr.msk.f32.vlgmr.msra.gmra.mrb[8].mxu1 %vm195_vm3, %v1060_v54 }
0x1058   :  { %v1129_v55 = vpop.f32.mrb[8].mxu1 }
0x1059   :  { %v1130_v56 = vadd.f32 %v1129_v55, %v1845_v38  ;;  %v1131_v57 = vpop.f32.mrb[9].mxu1  ;;  %v1470_v38 = vpack.c.bf16 %v1157_v33, %v1156_v1 }
0x105a   :  { %v1132_v58 = vadd.f32 %v1131_v57, %v1847_v39  ;;  %v1473_v39 = vpack.c.bf16 %v1159_v5, %v1158_v2 }
0x105b   :  { %v1289_v9 = vmul.f32 -1.442695, %v1130_v56  ;;  %1471 = vmatpush3.bf16.msra.mxu0 %v1470_v38 }
0x105c   :  { %1472 = vmatprep.subr.bf16.mxu0 %v1704_v3  ;;  %v1290_v16 = vmul.f32 -1.442695, %v1132_v58 }
0x105d   :  { %1589 = vpow2.f32 %v1289_v9 }
0x105e   :  { %1591 = vtanh.f32 %v1132_v58 }
0x105f   :  { %1474 = vmatpush3.bf16.msra.mxu0 %v1473_v39 }
0x1060   :  { %1475 = vmatprep.subr.bf16.mxu0 %v1704_v3 }
0x1063   :  { %1477 = vmatpush3.bf16.msra.mxu0 %v1476_v34 }
0x1064   :  { %1478 = vmatprep.subr.bf16.mxu0 %v1704_v3 }
0x1067   :  { %v1590_v14 = vpop.eup %1589  ;;  %1480 = vmatpush3.bf16.msra.mxu0 %v1479_v13 }
0x1068   :  { %v1140_v59 = vadd.f32 1.0, %v1590_v14  ;;  %v1592_v60 = vpop.eup %1591 }
0x106a   :  { %1593 = vrcp.f32 %v1140_v59 }
0x106b   :  { %1595 = vpow2.f32 %v1290_v16 }
0x1074   :  { %v1594_v61 = vpop.eup %1593 }
0x1075   :  { %v1148_v62 = vmul.f32 %v1594_v61, %v1592_v60  ;;  %v1596_v19 = vpop.eup %1595  ;;  %v1147_v12 = vmul.f32 %v1594_v61, %v1055_v52 }
0x1076   :  { %v1141_v21 = vadd.f32 1.0, %v1596_v19 }
0x1077   :  { %1150 = vrot.lane.b32.xlu0 %v1148_v62, %s1703_s2 }
0x1078   :  { %1597 = vrcp.f32 %v1141_v21 }
0x1082   :  { %v1598_v10 = vpop.eup %1597 }
0x10e9   :  { %v1151_v0 = vpop.permute.xlu0 %1150 }
0x10ea   :  { %v1153_v23 = vadd.f32 %v1151_v0, %v1147_v12 }
0x10ec   :  { %1599 = vtanh.f32 %v1153_v23 }
0x10f6   :  { %v1600_v17 = vpop.eup %1599 }
0x10f7   :  { %v1155_v20 = vmul.f32 %v1600_v17, %v1598_v10 }
0x10f9   :  { %1172 = vrot.lane.b32.xlu1 %v1155_v20, %s1703_s2 }
0x116b   :  { %v1173_v22 = vpop.permute.xlu1 %1172 }
0x116c   :  { %1319 = vmatmul.mubr.msk.f32.vlgmr.msra.gmra.mrb[12].mxu0 %vm195_vm3, %v1173_v22 }
0x123f   :  { %v1242_v28 = vpop.f32.mrb[12].mxu0 }
0x1240   :  { %v1243_v29 = vadd.f32 %v1291_v25, %v1242_v28  ;;  %v1320_v32 = vpop.f32.mrb[13].mxu0 }
0x1242   :  { %1246 = vst [vmem:[#allocation8] sm:$0x3] %v1243_v29 }
0x1243   :  { %1678 = shalt.err (!%p1675_p0)
}
0x1244   :  { %s1679_s21 = scalar_lea.hbm %s2017_s6, 32 }
0x1245   :  { %p1680_p1 = scmp.ne.s32.totalorder %s2017_s6, %s1679_s21  ;;  %p1683_p2 = scmp.lt.u32.totalorder %s1679_s21, %s2017_s6 }
0x1247   :  { %p1685_p3 = pnand %p1683_p2, %p1680_p1 }
0x1249   :  { %1688 = shalt.err (!%p1685_p3)
}
0x124a   :  { %1256 = dma.vmem_to_hbm [thread:$0]  %s1254_s18, 32, %s2017_s6, [#allocation4]  }
0x124b   :  { %1693 = dma.done.wait [#allocation4], 32  }
0x124c   :  { %1694 = vsyncadd [#allocation4], 4294967264 }
0x124d   :  { %1260 = vsyncpa [#allocation3], 1 }
0x124e   :  { %1261 = vsyncpa [#allocation6], 1 }
0x124f   :  { %1262 = vsyncpa [#allocation4], 1 }

</bundles_post_ra>
